<compile_context>
chip_gen: v7x
topology: tpu7x:2x2x1
jax: 0.10.0
libtpu: 0.0.40
codegen_flags: <defaults>
</compile_context>

<pallas_src>
import functools

import jax
import jax.numpy as jnp
from jax import lax
from jax.experimental import pallas as pl
from jax.experimental.pallas import tpu as pltpu

HEADS = 2          # GATConv(heads=2) in both conv layers
NEG_SLOPE = 0.2    # PyG GATConv default negative_slope
NEG_INF = -1e30    # additive mask value for non-edges
BN_EPS = 1e-5      # nn.BatchNorm1d default eps


def _round_up(v, m):
    return (v + m - 1) // m * m


# --------------------------------------------------------------------------
# Pallas kernel: fused 2x GATConv + Linear + BatchNorm1d(eval) + ReLU
# --------------------------------------------------------------------------
def gdn_kernel(x_ref, adj_ref, p_ref, out_ref, *, f_in, c, f_pad, c_pad):
    """x_ref:[N,f_in]  adj_ref:[N,N] (adj[dst,src]!=0, self loops included)
    p_ref:[R,c] packed parameter slab (see _pack_params)  out_ref:[N,1]."""
    H = HEADS
    x = x_ref[...]

    # Additive attention mask, built ONCE and reused for both layers / heads.
    # Every row has a self loop, so exp() of masked entries underflows to 0
    # and no post-exp re-masking is needed.
    neg_mask = jnp.where(adj_ref[...] > 0.0, 0.0, NEG_INF)            # [N, N]

    w1_base = 0
    w2_base = H * f_pad
    v_base = w2_base + H * H * c_pad
    dn = (((1,), (1,)), ((), ()))          # contract last dims, no batch dims

    def vec(i):                            # one packed [1, c] parameter row
        return p_ref[pl.ds(v_base + i, 1), :]

    def attention(h, a_src_row, a_dst_row):
        # Per-node logits as two tiny MXU dots: dst logits as a column [N,1],
        # src logits directly as a row [1,N] (N lands on the lane axis).
        adst = lax.dot_general(h, a_dst_row, dn,
                               preferred_element_type=jnp.float32)    # [N, 1]
        asrc = lax.dot_general(a_src_row, h, dn,
                               preferred_element_type=jnp.float32)    # [1, N]
        e = adst + asrc                                               # [N, N]
        e = jnp.where(e > 0.0, e, NEG_SLOPE * e)                      # LeakyReLU
        e = e + neg_mask                                              # mask
        e = e - jnp.max(e, axis=1, keepdims=True)                     # row max
        p = jnp.exp(e)
        inv = pl.reciprocal(jnp.sum(p, axis=1, keepdims=True), approx=True)
        return p * inv                                                # alpha

    # ---- conv1: GATConv(f_in -> c, heads=2, concat=True) -------------------
    x1 = []                                # per-head outputs, never concatenated
    for b in range(H):
        w1_b = p_ref[pl.ds(w1_base + b * f_pad, f_in), :]             # [f_in, c]
        h = jnp.dot(x, w1_b, preferred_element_type=jnp.float32)      # [N, c]
        alpha = attention(h, vec(0 * H + b), vec(1 * H + b))
        x1.append(jnp.dot(alpha, h, preferred_element_type=jnp.float32)
                  + vec(2 * H + b))        # + per-head bias b1
    # F.dropout(training=False) -> identity (eval mode)

    # ---- conv2 (+ fc and BatchNorm scale folded into the aggregation) ------
    acc = None
    for b in range(H):
        h = jnp.dot(x1[0], p_ref[pl.ds(w2_base + (b * H) * c_pad, c), :],
                    preferred_element_type=jnp.float32)
        for q in range(1, H):
            w2_bq = p_ref[pl.ds(w2_base + (b * H + q) * c_pad, c), :]
            h = h + jnp.dot(x1[q], w2_bq, preferred_element_type=jnp.float32)
        alpha = attention(h, vec(3 * H + b), vec(4 * H + b))
        # fold fc (+ BN scale): alpha @ (h @ wfc_b)  -> [N,N] x [N,1] aggregation
        v = lax.dot_general(h, vec(5 * H + b), dn,
                            preferred_element_type=jnp.float32)       # [N, 1]
        term = jnp.dot(alpha, v, preferred_element_type=jnp.float32)  # [N, 1]
        acc = term if acc is None else acc + term

    # folded scalar: (b2 @ wfc + bfc) * bn_scale + bn_shift
    bias = p_ref[pl.ds(v_base + 6 * H, 1), 0:1]                       # [1, 1]
    out_ref[...] = jnp.maximum(acc + bias, 0.0)                       # ReLU


# --------------------------------------------------------------------------
# Plain-JAX glue: parameter packing, adjacency densification, wrapper
# --------------------------------------------------------------------------
def _pack_params(p, f_in, c):
    """Pack all GAT / fc / BatchNorm parameters into one f32 slab [R, c].

    Row layout (head-major so the kernel never lane-slices at c boundaries):
      [0, H*f_pad)              conv1 weight, per head               [f_in, c]
      [H*f_pad, +H*H*c_pad)     conv2 weight, [out_head, in_head]    [c, c]
      v_base + 0*H + b          conv1 att_src (head b)               [c]
      v_base + 1*H + b          conv1 att_dst (head b)
      v_base + 2*H + b          conv1 bias    (head b)
      v_base + 3*H + b          conv2 att_src (head b)
      v_base + 4*H + b          conv2 att_dst (head b)
      v_base + 5*H + b          fc weight * bn_scale (head b)
      v_base + 6*H   (col 0)    (b2 @ wfc + bfc) * bn_scale + bn_shift
    """
    H = HEADS
    f_pad, c_pad = _round_up(f_in, 8), _round_up(c, 8)
    v_base = H * f_pad + H * H * c_pad
    rows = _round_up(v_base + 6 * H + 1, 8)
    slab = jnp.zeros((rows, c), jnp.float32)

    # BatchNorm1d(1) eval mode folded into the final Linear: y -> y*s + t
    s = p["bn_gamma"][0] / jnp.sqrt(p["bn_var"][0] + BN_EPS)
    t = p["bn_beta"][0] - p["bn_mean"][0] * s
    wfc_s = p["wfc"][:, 0] * s
    scalar = (p["b2"] @ p["wfc"][:, 0] + p["bfc"][0]) * s + t

    for b in range(H):
        r = b * f_pad
        slab = slab.at[r:r + f_in, :].set(p["w1"][:, b * c:(b + 1) * c])
        for q in range(H):
            r = H * f_pad + (b * H + q) * c_pad
            slab = slab.at[r:r + c, :].set(
                p["w2"][q * c:(q + 1) * c, b * c:(b + 1) * c])
        slab = slab.at[v_base + 0 * H + b, :].set(p["a1s"][b])
        slab = slab.at[v_base + 1 * H + b, :].set(p["a1d"][b])
        slab = slab.at[v_base + 2 * H + b, :].set(p["b1"][b * c:(b + 1) * c])
        slab = slab.at[v_base + 3 * H + b, :].set(p["a2s"][b])
        slab = slab.at[v_base + 4 * H + b, :].set(p["a2d"][b])
        slab = slab.at[v_base + 5 * H + b, :].set(wfc_s[b * c:(b + 1) * c])
    slab = slab.at[v_base + 6 * H, 0].set(scalar)
    return slab, f_pad, c_pad


def _batched_adjacency(edge_index, batch_num, node_num):
    """Densify get_batch_edge_index(...) into adj[dst, src] (+ self loops)."""
    n = batch_num * node_num
    offs = jnp.arange(batch_num, dtype=edge_index.dtype) * node_num
    src = (edge_index[0][None, :] + offs[:, None]).reshape(-1)
    dst = (edge_index[1][None, :] + offs[:, None]).reshape(-1)
    adj = jnp.zeros((n, n), jnp.float32)
    adj = adj.at[dst, src].set(1.0)
    # PyG GATConv add_self_loops=True; also guarantees every softmax row is
    # non-empty (required by the additive in-kernel mask).
    adj = adj.at[jnp.arange(n), jnp.arange(n)].set(1.0)
    return adj


def _gat_pallas(x, adj, slab, f_in, c, f_pad, c_pad):
    n = x.shape[0]
    # Rough VMEM budget: adj + a few [N,N] f32 softmax temporaries, with
    # headroom; capped at v7x's 64 MiB physical VMEM.
    vmem_limit = int(min(64 * 1024 * 1024,
                         max(16 * 1024 * 1024, 12 * n * n * 4)))
    return pl.pallas_call(
        functools.partial(gdn_kernel, f_in=f_in, c=c, f_pad=f_pad, c_pad=c_pad),
        out_shape=jax.ShapeDtypeStruct((n, 1), jnp.float32),
        in_specs=[pl.BlockSpec(memory_space=pltpu.MemorySpace.VMEM)] * 3,
        out_specs=pl.BlockSpec(memory_space=pltpu.MemorySpace.VMEM),
        compiler_params=pltpu.CompilerParams(vmem_limit_bytes=vmem_limit),
    )(x, adj, slab)


def gdn_forward(data, edge_index_sets, params, inter_dim):
    """GDN.forward (eval mode). data: [B, win, node] -> [B * n_sets, 1, node]."""
    batch_num, win, node_num = data.shape
    x = data.reshape(-1, win)                     # torch .view(-1, all_feature)
    slab, f_pad, c_pad = _pack_params(params, win, inter_dim)
    outs = []
    for edge_index in edge_index_sets:            # shared gnn_layers params
        adj = _batched_adjacency(edge_index, batch_num, node_num)
        outs.append(_gat_pallas(x, adj, slab, win, inter_dim, f_pad, c_pad))
    y = jnp.concatenate(outs, axis=1)             # [B*node, n_sets]
    return y.reshape(-1, 1, node_num)             # torch .view(-1, 1, node_num)


# --------------------------------------------------------------------------
# Pure-JAX reference (unfused, mirrors the PyTorch forward)
# --------------------------------------------------------------------------
def gdn_reference(data, edge_index_sets, params, inter_dim):
    batch_num, win, node_num = data.shape
    x0 = data.reshape(-1, win)
    H, C = HEADS, inter_dim

    def gat_layer(x, adj, w, a_s, a_d, bias):
        h = x @ w
        outs = []
        for hd in range(H):
            hh = h[:, hd * C:(hd + 1) * C]
            asrc = hh @ a_s[hd]
            adst = hh @ a_d[hd]
            e = adst[:, None] + asrc[None, :]
            e = jnp.where(e > 0, e, NEG_SLOPE * e)
            e = jnp.where(adj > 0, e, NEG_INF)
            e = e - jnp.max(e, axis=1, keepdims=True)
            p = jnp.where(adj > 0, jnp.exp(e), 0.0)
            alpha = p / jnp.sum(p, axis=1, keepdims=True)
            outs.append(alpha @ hh)
        return jnp.concatenate(outs, axis=1) + bias

    outs = []
    for edge_index in edge_index_sets:
        adj = _batched_adjacency(edge_index, batch_num, node_num)
        x1 = gat_layer(x0, adj, params["w1"], params["a1s"], params["a1d"],
                       params["b1"])
        x2 = gat_layer(x1, adj, params["w2"], params["a2s"], params["a2d"],
                       params["b2"])
        y = x2 @ params["wfc"] + params["bfc"]
        s = params["bn_gamma"] / jnp.sqrt(params["bn_var"] + BN_EPS)
        y = (y - params["bn_mean"]) * s + params["bn_beta"]
        outs.append(jnp.maximum(y, 0.0))
    y = jnp.concatenate(outs, axis=1)
    return y.reshape(-1, 1, node_num)


def _glorot(key, shape):
    fan_in, fan_out = shape[-2], shape[-1]
    lim = jnp.sqrt(6.0 / (fan_in + fan_out))
    return jax.random.uniform(key, shape, jnp.float32, -lim, lim)


if __name__ == "__main__":
    BATCH = 2        # batch_num
    NODE_NUM = 8     # node_num
    WIN = 8          # win_size == in_channel == num_node_features
    INTER = 16       # out_layer_inter_dim (toy)
    E = 24           # edges in the single edge_index set

    key = jax.random.PRNGKey(0)
    ks = jax.random.split(key, 20)

    data = jax.random.normal(ks[0], (BATCH, WIN, NODE_NUM), jnp.float32)
    src = jax.random.randint(ks[1], (E,), 0, NODE_NUM, jnp.int32)
    dst = jax.random.randint(ks[2], (E,), 0, NODE_NUM, jnp.int32)
    edge_index_sets = [jnp.stack([src, dst], axis=0)]     # single edge set

    params = {
        # conv1: GATConv(WIN -> INTER, heads=2, concat)
        "w1": _glorot(ks[3], (WIN, HEADS * INTER)),
        "a1s": _glorot(ks[4], (HEADS, INTER)),
        "a1d": _glorot(ks[5], (HEADS, INTER)),
        "b1": 0.1 * jax.random.normal(ks[6], (HEADS * INTER,), jnp.float32),
        # conv2: GATConv(2*INTER -> INTER, heads=2, concat)
        "w2": _glorot(ks[7], (HEADS * INTER, HEADS * INTER)),
        "a2s": _glorot(ks[8], (HEADS, INTER)),
        "a2d": _glorot(ks[9], (HEADS, INTER)),
        "b2": 0.1 * jax.random.normal(ks[10], (HEADS * INTER,), jnp.float32),
        # fc: Linear(2*INTER -> 1)
        "wfc": _glorot(ks[11], (HEADS * INTER, 1)),
        "bfc": 0.1 * jax.random.normal(ks[12], (1,), jnp.float32),
        # BatchNorm1d(1) eval-mode running stats + affine params
        "bn_gamma": 1.0 + 0.1 * jax.random.normal(ks[13], (1,), jnp.float32),
        "bn_beta": 0.1 * jax.random.normal(ks[14], (1,), jnp.float32),
        "bn_mean": 0.1 * jax.random.normal(ks[15], (1,), jnp.float32),
        "bn_var": 1.0 + 0.1 * jax.random.uniform(ks[16], (1,), jnp.float32),
    }

    out = gdn_forward(data, edge_index_sets, params, INTER)
    out = jax.block_until_ready(out)
    ref = gdn_reference(data, edge_index_sets, params, INTER)

    assert out.shape == (BATCH, 1, NODE_NUM), out.shape
    # rtol accounts for the EUP approximate-reciprocal softmax normalization.
    assert jnp.allclose(out, ref, atol=2e-3, rtol=2e-2), (
        "mismatch vs reference, max abs err = "
        + str(float(jnp.max(jnp.abs(out - ref)))))

    print("KERNEL_OK")
</pallas_src>

<mosaic_0001>
module attributes {stable_mosaic.version = 11 : i64} {
  func.func @gdn_kernel(%arg0: memref<16x8xf32, #tpu.memory_space<vmem>>, %arg1: memref<16x16xf32, #tpu.memory_space<vmem>>, %arg2: memref<96x16xf32, #tpu.memory_space<vmem>>, %arg3: memref<16x1xf32, #tpu.memory_space<vmem>>) attributes {dimension_semantics = [], scalar_prefetch = 0 : i64, scratch_operands = 0 : i64, tpu.core_type = #tpu.core_type<tc>} {
    %c0 = arith.constant 0 : index
    %c0_0 = arith.constant 0 : index
    %0 = vector.load %arg0[%c0, %c0_0] : memref<16x8xf32, #tpu.memory_space<vmem>>, vector<16x8xf32>
    %c0_1 = arith.constant 0 : index
    %c0_2 = arith.constant 0 : index
    %1 = vector.load %arg1[%c0_1, %c0_2] : memref<16x16xf32, #tpu.memory_space<vmem>>, vector<16x16xf32>
    %cst = arith.constant 0.000000e+00 : f32
    %2 = vector.broadcast %cst : f32 to vector<16x16xf32>
    %3 = arith.cmpf ogt, %1, %2 : vector<16x16xf32>
    %cst_3 = arith.constant 0.000000e+00 : f32
    %cst_4 = arith.constant -1.000000e+30 : f32
    %4 = vector.broadcast %cst_3 : f32 to vector<16x16xf32>
    %5 = vector.broadcast %cst_4 : f32 to vector<16x16xf32>
    %6 = arith.select %3, %4, %5 : vector<16x16xi1>, vector<16x16xf32>
    %c0_5 = arith.constant 0 : index
    %c0_6 = arith.constant 0 : index
    %7 = vector.load %arg2[%c0_5, %c0_6] : memref<96x16xf32, #tpu.memory_space<vmem>>, vector<8x16xf32>
    %cst_7 = arith.constant dense<0.000000e+00> : vector<16x16xf32>
    %8 = tpu.matmul %0, %7, %cst_7 {dimension_numbers = #tpu.dot_dimension_numbers<[1], [0], [0], [1], [0, 0, 1, 1], [], []>} : vector<16x8xf32>, vector<8x16xf32>, vector<16x16xf32> -> vector<16x16xf32>
    %c80 = arith.constant 80 : index
    %c0_8 = arith.constant 0 : index
    %9 = vector.load %arg2[%c80, %c0_8] : memref<96x16xf32, #tpu.memory_space<vmem>>, vector<1x16xf32>
    %c82 = arith.constant 82 : index
    %c0_9 = arith.constant 0 : index
    %10 = vector.load %arg2[%c82, %c0_9] : memref<96x16xf32, #tpu.memory_space<vmem>>, vector<1x16xf32>
    %cst_10 = arith.constant dense<0.000000e+00> : vector<16x1xf32>
    %11 = tpu.matmul %8, %10, %cst_10 {dimension_numbers = #tpu.dot_dimension_numbers<[1], [1], [0], [0], [0, 0, 1, 0], [], []>} : vector<16x16xf32>, vector<1x16xf32>, vector<16x1xf32> -> vector<16x1xf32>
    %cst_11 = arith.constant dense<0.000000e+00> : vector<1x16xf32>
    %12 = tpu.matmul %9, %8, %cst_11 {dimension_numbers = #tpu.dot_dimension_numbers<[1], [1], [0], [0], [0, 0, 1, 0], [], []>} : vector<1x16xf32>, vector<16x16xf32>, vector<1x16xf32> -> vector<1x16xf32>
    %13 = vector.broadcast %11 : vector<16x1xf32> to vector<16x16xf32>
    %14 = vector.broadcast %12 : vector<1x16xf32> to vector<16x16xf32>
    %15 = arith.addf %13, %14 : vector<16x16xf32>
    %cst_12 = arith.constant 0.000000e+00 : f32
    %16 = vector.broadcast %cst_12 : f32 to vector<16x16xf32>
    %17 = arith.cmpf ogt, %15, %16 : vector<16x16xf32>
    %cst_13 = arith.constant 2.000000e-01 : f32
    %18 = vector.broadcast %cst_13 : f32 to vector<16x16xf32>
    %19 = arith.mulf %18, %15 : vector<16x16xf32>
    %20 = arith.select %17, %15, %19 : vector<16x16xi1>, vector<16x16xf32>
    %21 = arith.addf %20, %6 : vector<16x16xf32>
    %cst_14 = arith.constant dense<0xFF800000> : vector<16xf32>
    %22 = vector.multi_reduction <maximumf>, %21, %cst_14 [1] : vector<16x16xf32> to vector<16xf32>
    %23 = vector.shape_cast %22 : vector<16xf32> to vector<16x1xf32>
    %24 = vector.broadcast %23 : vector<16x1xf32> to vector<16x16xf32>
    %25 = arith.subf %21, %24 : vector<16x16xf32>
    %26 = math.exp %25 : vector<16x16xf32>
    %cst_15 = arith.constant dense<0.000000e+00> : vector<16xf32>
    %27 = vector.multi_reduction <add>, %26, %cst_15 [1] : vector<16x16xf32> to vector<16xf32>
    %28 = vector.shape_cast %27 : vector<16xf32> to vector<16x1xf32>
    %29 = tpu.reciprocal %28 {approx = true} : vector<16x1xf32> -> vector<16x1xf32>
    %30 = vector.broadcast %29 : vector<16x1xf32> to vector<16x16xf32>
    %31 = arith.mulf %26, %30 : vector<16x16xf32>
    %cst_16 = arith.constant dense<0.000000e+00> : vector<16x16xf32>
    %32 = tpu.matmul %31, %8, %cst_16 {dimension_numbers = #tpu.dot_dimension_numbers<[1], [0], [0], [1], [0, 0, 1, 1], [], []>} : vector<16x16xf32>, vector<16x16xf32>, vector<16x16xf32> -> vector<16x16xf32>
    %c84 = arith.constant 84 : index
    %c0_17 = arith.constant 0 : index
    %33 = vector.load %arg2[%c84, %c0_17] : memref<96x16xf32, #tpu.memory_space<vmem>>, vector<1x16xf32>
    %34 = vector.broadcast %33 : vector<1x16xf32> to vector<16x16xf32>
    %35 = arith.addf %32, %34 : vector<16x16xf32>
    %c8 = arith.constant 8 : index
    %c0_18 = arith.constant 0 : index
    %36 = vector.load %arg2[%c8, %c0_18] : memref<96x16xf32, #tpu.memory_space<vmem>>, vector<8x16xf32>
    %cst_19 = arith.constant dense<0.000000e+00> : vector<16x16xf32>
    %37 = tpu.matmul %0, %36, %cst_19 {dimension_numbers = #tpu.dot_dimension_numbers<[1], [0], [0], [1], [0, 0, 1, 1], [], []>} : vector<16x8xf32>, vector<8x16xf32>, vector<16x16xf32> -> vector<16x16xf32>
    %c81 = arith.constant 81 : index
    %c0_20 = arith.constant 0 : index
    %38 = vector.load %arg2[%c81, %c0_20] : memref<96x16xf32, #tpu.memory_space<vmem>>, vector<1x16xf32>
    %c83 = arith.constant 83 : index
    %c0_21 = arith.constant 0 : index
    %39 = vector.load %arg2[%c83, %c0_21] : memref<96x16xf32, #tpu.memory_space<vmem>>, vector<1x16xf32>
    %cst_22 = arith.constant dense<0.000000e+00> : vector<16x1xf32>
    %40 = tpu.matmul %37, %39, %cst_22 {dimension_numbers = #tpu.dot_dimension_numbers<[1], [1], [0], [0], [0, 0, 1, 0], [], []>} : vector<16x16xf32>, vector<1x16xf32>, vector<16x1xf32> -> vector<16x1xf32>
    %cst_23 = arith.constant dense<0.000000e+00> : vector<1x16xf32>
    %41 = tpu.matmul %38, %37, %cst_23 {dimension_numbers = #tpu.dot_dimension_numbers<[1], [1], [0], [0], [0, 0, 1, 0], [], []>} : vector<1x16xf32>, vector<16x16xf32>, vector<1x16xf32> -> vector<1x16xf32>
    %42 = vector.broadcast %40 : vector<16x1xf32> to vector<16x16xf32>
    %43 = vector.broadcast %41 : vector<1x16xf32> to vector<16x16xf32>
    %44 = arith.addf %42, %43 : vector<16x16xf32>
    %cst_24 = arith.constant 0.000000e+00 : f32
    %45 = vector.broadcast %cst_24 : f32 to vector<16x16xf32>
    %46 = arith.cmpf ogt, %44, %45 : vector<16x16xf32>
    %cst_25 = arith.constant 2.000000e-01 : f32
    %47 = vector.broadcast %cst_25 : f32 to vector<16x16xf32>
    %48 = arith.mulf %47, %44 : vector<16x16xf32>
    %49 = arith.select %46, %44, %48 : vector<16x16xi1>, vector<16x16xf32>
    %50 = arith.addf %49, %6 : vector<16x16xf32>
    %cst_26 = arith.constant dense<0xFF800000> : vector<16xf32>
    %51 = vector.multi_reduction <maximumf>, %50, %cst_26 [1] : vector<16x16xf32> to vector<16xf32>
    %52 = vector.shape_cast %51 : vector<16xf32> to vector<16x1xf32>
    %53 = vector.broadcast %52 : vector<16x1xf32> to vector<16x16xf32>
    %54 = arith.subf %50, %53 : vector<16x16xf32>
    %55 = math.exp %54 : vector<16x16xf32>
    %cst_27 = arith.constant dense<0.000000e+00> : vector<16xf32>
    %56 = vector.multi_reduction <add>, %55, %cst_27 [1] : vector<16x16xf32> to vector<16xf32>
    %57 = vector.shape_cast %56 : vector<16xf32> to vector<16x1xf32>
    %58 = tpu.reciprocal %57 {approx = true} : vector<16x1xf32> -> vector<16x1xf32>
    %59 = vector.broadcast %58 : vector<16x1xf32> to vector<16x16xf32>
    %60 = arith.mulf %55, %59 : vector<16x16xf32>
    %cst_28 = arith.constant dense<0.000000e+00> : vector<16x16xf32>
    %61 = tpu.matmul %60, %37, %cst_28 {dimension_numbers = #tpu.dot_dimension_numbers<[1], [0], [0], [1], [0, 0, 1, 1], [], []>} : vector<16x16xf32>, vector<16x16xf32>, vector<16x16xf32> -> vector<16x16xf32>
    %c85 = arith.constant 85 : index
    %c0_29 = arith.constant 0 : index
    %62 = vector.load %arg2[%c85, %c0_29] : memref<96x16xf32, #tpu.memory_space<vmem>>, vector<1x16xf32>
    %63 = vector.broadcast %62 : vector<1x16xf32> to vector<16x16xf32>
    %64 = arith.addf %61, %63 : vector<16x16xf32>
    %c16 = arith.constant 16 : index
    %c0_30 = arith.constant 0 : index
    %65 = vector.load %arg2[%c16, %c0_30] : memref<96x16xf32, #tpu.memory_space<vmem>>, vector<16x16xf32>
    %cst_31 = arith.constant dense<0.000000e+00> : vector<16x16xf32>
    %66 = tpu.matmul %35, %65, %cst_31 {dimension_numbers = #tpu.dot_dimension_numbers<[1], [0], [0], [1], [0, 0, 1, 1], [], []>} : vector<16x16xf32>, vector<16x16xf32>, vector<16x16xf32> -> vector<16x16xf32>
    %c32 = arith.constant 32 : index
    %c0_32 = arith.constant 0 : index
    %67 = vector.load %arg2[%c32, %c0_32] : memref<96x16xf32, #tpu.memory_space<vmem>>, vector<16x16xf32>
    %cst_33 = arith.constant dense<0.000000e+00> : vector<16x16xf32>
    %68 = tpu.matmul %64, %67, %cst_33 {dimension_numbers = #tpu.dot_dimension_numbers<[1], [0], [0], [1], [0, 0, 1, 1], [], []>} : vector<16x16xf32>, vector<16x16xf32>, vector<16x16xf32> -> vector<16x16xf32>
    %69 = arith.addf %66, %68 : vector<16x16xf32>
    %c86 = arith.constant 86 : index
    %c0_34 = arith.constant 0 : index
    %70 = vector.load %arg2[%c86, %c0_34] : memref<96x16xf32, #tpu.memory_space<vmem>>, vector<1x16xf32>
    %c88 = arith.constant 88 : index
    %c0_35 = arith.constant 0 : index
    %71 = vector.load %arg2[%c88, %c0_35] : memref<96x16xf32, #tpu.memory_space<vmem>>, vector<1x16xf32>
    %cst_36 = arith.constant dense<0.000000e+00> : vector<16x1xf32>
    %72 = tpu.matmul %69, %71, %cst_36 {dimension_numbers = #tpu.dot_dimension_numbers<[1], [1], [0], [0], [0, 0, 1, 0], [], []>} : vector<16x16xf32>, vector<1x16xf32>, vector<16x1xf32> -> vector<16x1xf32>
    %cst_37 = arith.constant dense<0.000000e+00> : vector<1x16xf32>
    %73 = tpu.matmul %70, %69, %cst_37 {dimension_numbers = #tpu.dot_dimension_numbers<[1], [1], [0], [0], [0, 0, 1, 0], [], []>} : vector<1x16xf32>, vector<16x16xf32>, vector<1x16xf32> -> vector<1x16xf32>
    %74 = vector.broadcast %72 : vector<16x1xf32> to vector<16x16xf32>
    %75 = vector.broadcast %73 : vector<1x16xf32> to vector<16x16xf32>
    %76 = arith.addf %74, %75 : vector<16x16xf32>
    %cst_38 = arith.constant 0.000000e+00 : f32
    %77 = vector.broadcast %cst_38 : f32 to vector<16x16xf32>
    %78 = arith.cmpf ogt, %76, %77 : vector<16x16xf32>
    %cst_39 = arith.constant 2.000000e-01 : f32
    %79 = vector.broadcast %cst_39 : f32 to vector<16x16xf32>
    %80 = arith.mulf %79, %76 : vector<16x16xf32>
    %81 = arith.select %78, %76, %80 : vector<16x16xi1>, vector<16x16xf32>
    %82 = arith.addf %81, %6 : vector<16x16xf32>
    %cst_40 = arith.constant dense<0xFF800000> : vector<16xf32>
    %83 = vector.multi_reduction <maximumf>, %82, %cst_40 [1] : vector<16x16xf32> to vector<16xf32>
    %84 = vector.shape_cast %83 : vector<16xf32> to vector<16x1xf32>
    %85 = vector.broadcast %84 : vector<16x1xf32> to vector<16x16xf32>
    %86 = arith.subf %82, %85 : vector<16x16xf32>
    %87 = math.exp %86 : vector<16x16xf32>
    %cst_41 = arith.constant dense<0.000000e+00> : vector<16xf32>
    %88 = vector.multi_reduction <add>, %87, %cst_41 [1] : vector<16x16xf32> to vector<16xf32>
    %89 = vector.shape_cast %88 : vector<16xf32> to vector<16x1xf32>
    %90 = tpu.reciprocal %89 {approx = true} : vector<16x1xf32> -> vector<16x1xf32>
    %91 = vector.broadcast %90 : vector<16x1xf32> to vector<16x16xf32>
    %92 = arith.mulf %87, %91 : vector<16x16xf32>
    %c90 = arith.constant 90 : index
    %c0_42 = arith.constant 0 : index
    %93 = vector.load %arg2[%c90, %c0_42] : memref<96x16xf32, #tpu.memory_space<vmem>>, vector<1x16xf32>
    %cst_43 = arith.constant dense<0.000000e+00> : vector<16x1xf32>
    %94 = tpu.matmul %69, %93, %cst_43 {dimension_numbers = #tpu.dot_dimension_numbers<[1], [1], [0], [0], [0, 0, 1, 0], [], []>} : vector<16x16xf32>, vector<1x16xf32>, vector<16x1xf32> -> vector<16x1xf32>
    %cst_44 = arith.constant dense<0.000000e+00> : vector<16x1xf32>
    %95 = tpu.matmul %92, %94, %cst_44 {dimension_numbers = #tpu.dot_dimension_numbers<[1], [0], [0], [1], [0, 0, 1, 1], [], []>} : vector<16x16xf32>, vector<16x1xf32>, vector<16x1xf32> -> vector<16x1xf32>
    %c48 = arith.constant 48 : index
    %c0_45 = arith.constant 0 : index
    %96 = vector.load %arg2[%c48, %c0_45] : memref<96x16xf32, #tpu.memory_space<vmem>>, vector<16x16xf32>
    %cst_46 = arith.constant dense<0.000000e+00> : vector<16x16xf32>
    %97 = tpu.matmul %35, %96, %cst_46 {dimension_numbers = #tpu.dot_dimension_numbers<[1], [0], [0], [1], [0, 0, 1, 1], [], []>} : vector<16x16xf32>, vector<16x16xf32>, vector<16x16xf32> -> vector<16x16xf32>
    %c64 = arith.constant 64 : index
    %c0_47 = arith.constant 0 : index
    %98 = vector.load %arg2[%c64, %c0_47] : memref<96x16xf32, #tpu.memory_space<vmem>>, vector<16x16xf32>
    %cst_48 = arith.constant dense<0.000000e+00> : vector<16x16xf32>
    %99 = tpu.matmul %64, %98, %cst_48 {dimension_numbers = #tpu.dot_dimension_numbers<[1], [0], [0], [1], [0, 0, 1, 1], [], []>} : vector<16x16xf32>, vector<16x16xf32>, vector<16x16xf32> -> vector<16x16xf32>
    %100 = arith.addf %97, %99 : vector<16x16xf32>
    %c87 = arith.constant 87 : index
    %c0_49 = arith.constant 0 : index
    %101 = vector.load %arg2[%c87, %c0_49] : memref<96x16xf32, #tpu.memory_space<vmem>>, vector<1x16xf32>
    %c89 = arith.constant 89 : index
    %c0_50 = arith.constant 0 : index
    %102 = vector.load %arg2[%c89, %c0_50] : memref<96x16xf32, #tpu.memory_space<vmem>>, vector<1x16xf32>
    %cst_51 = arith.constant dense<0.000000e+00> : vector<16x1xf32>
    %103 = tpu.matmul %100, %102, %cst_51 {dimension_numbers = #tpu.dot_dimension_numbers<[1], [1], [0], [0], [0, 0, 1, 0], [], []>} : vector<16x16xf32>, vector<1x16xf32>, vector<16x1xf32> -> vector<16x1xf32>
    %cst_52 = arith.constant dense<0.000000e+00> : vector<1x16xf32>
    %104 = tpu.matmul %101, %100, %cst_52 {dimension_numbers = #tpu.dot_dimension_numbers<[1], [1], [0], [0], [0, 0, 1, 0], [], []>} : vector<1x16xf32>, vector<16x16xf32>, vector<1x16xf32> -> vector<1x16xf32>
    %105 = vector.broadcast %103 : vector<16x1xf32> to vector<16x16xf32>
    %106 = vector.broadcast %104 : vector<1x16xf32> to vector<16x16xf32>
    %107 = arith.addf %105, %106 : vector<16x16xf32>
    %cst_53 = arith.constant 0.000000e+00 : f32
    %108 = vector.broadcast %cst_53 : f32 to vector<16x16xf32>
    %109 = arith.cmpf ogt, %107, %108 : vector<16x16xf32>
    %cst_54 = arith.constant 2.000000e-01 : f32
    %110 = vector.broadcast %cst_54 : f32 to vector<16x16xf32>
    %111 = arith.mulf %110, %107 : vector<16x16xf32>
    %112 = arith.select %109, %107, %111 : vector<16x16xi1>, vector<16x16xf32>
    %113 = arith.addf %112, %6 : vector<16x16xf32>
    %cst_55 = arith.constant dense<0xFF800000> : vector<16xf32>
    %114 = vector.multi_reduction <maximumf>, %113, %cst_55 [1] : vector<16x16xf32> to vector<16xf32>
    %115 = vector.shape_cast %114 : vector<16xf32> to vector<16x1xf32>
    %116 = vector.broadcast %115 : vector<16x1xf32> to vector<16x16xf32>
    %117 = arith.subf %113, %116 : vector<16x16xf32>
    %118 = math.exp %117 : vector<16x16xf32>
    %cst_56 = arith.constant dense<0.000000e+00> : vector<16xf32>
    %119 = vector.multi_reduction <add>, %118, %cst_56 [1] : vector<16x16xf32> to vector<16xf32>
    %120 = vector.shape_cast %119 : vector<16xf32> to vector<16x1xf32>
    %121 = tpu.reciprocal %120 {approx = true} : vector<16x1xf32> -> vector<16x1xf32>
    %122 = vector.broadcast %121 : vector<16x1xf32> to vector<16x16xf32>
    %123 = arith.mulf %118, %122 : vector<16x16xf32>
    %c91 = arith.constant 91 : index
    %c0_57 = arith.constant 0 : index
    %124 = vector.load %arg2[%c91, %c0_57] : memref<96x16xf32, #tpu.memory_space<vmem>>, vector<1x16xf32>
    %cst_58 = arith.constant dense<0.000000e+00> : vector<16x1xf32>
    %125 = tpu.matmul %100, %124, %cst_58 {dimension_numbers = #tpu.dot_dimension_numbers<[1], [1], [0], [0], [0, 0, 1, 0], [], []>} : vector<16x16xf32>, vector<1x16xf32>, vector<16x1xf32> -> vector<16x1xf32>
    %cst_59 = arith.constant dense<0.000000e+00> : vector<16x1xf32>
    %126 = tpu.matmul %123, %125, %cst_59 {dimension_numbers = #tpu.dot_dimension_numbers<[1], [0], [0], [1], [0, 0, 1, 1], [], []>} : vector<16x16xf32>, vector<16x1xf32>, vector<16x1xf32> -> vector<16x1xf32>
    %127 = arith.addf %95, %126 : vector<16x1xf32>
    %c92 = arith.constant 92 : index
    %c0_60 = arith.constant 0 : index
    %128 = vector.load %arg2[%c92, %c0_60] : memref<96x16xf32, #tpu.memory_space<vmem>>, vector<1x1xf32>
    %129 = vector.broadcast %128 : vector<1x1xf32> to vector<16x1xf32>
    %130 = arith.addf %127, %129 : vector<16x1xf32>
    %cst_61 = arith.constant 0.000000e+00 : f32
    %131 = vector.broadcast %cst_61 : f32 to vector<16x1xf32>
    %132 = arith.maximumf %130, %131 : vector<16x1xf32>
    %c0_62 = arith.constant 0 : index
    %c0_63 = arith.constant 0 : index
    %133 = vector.load %arg3[%c0_62, %c0_63] : memref<16x1xf32, #tpu.memory_space<vmem>>, vector<16x1xf32>
    tpu.vector_store %arg3[%c0_62, %c0_63], %132 {strides = array<i32>} : memref<16x1xf32, #tpu.memory_space<vmem>>, vector<16x1xf32>,
    return
  }
}

</mosaic_0001>

<bundles_post_ra>
// kernel: tpu_custom_call.1
= control target key start
LH: loop header
LB: loop body
LE: loop exit
PB: predicated region body
PF: predicated region fallthrough
CT: control target
= control target key end

     0   :  { %vm23_vm0 = vcmask 64512   ;;  %v1669_v3 = vmov 0.0|0.0   ;;  %vm1670_vm1 = vmmov 0   ;;  %v1671_v4 = vmov 0.0   ;;  %s1910_s2 = inlined_call_operand.vmem [shape: f32[96,16], index: 2, kind: input, shape index: {}]   ;;  %s1911_s0 = inlined_call_operand.vmem [shape: f32[16,8], index: 0, kind: input, shape index: {}]   ;;  %s1912_s1 = inlined_call_operand.vmem [shape: f32[16,16], index: 1, kind: input, shape index: {}]   ;;  %s1913_s3 = inlined_call_operand.vmem [shape: f32[16,1], index: 3, kind: output, shape index: {}]  }
   0x1   :  { %v22_v0 = vld [vmem:[%s1910_s2] sm:$0xff]  ;;  %v1704_v2 = vld [vmem:[%s1911_s0 + $0x8] sm:$0xff]  ;;  %vm113_vm2 = vcmask 130048   ;;  %v1396_v5 = vld [vmem:[%s1910_s2 + $0x52] ss:$0 sm:$0xff]  ;;  %v199_v15 = vlaneseq  ;;  %vm1387_vm14 = vcmask 7168  }
   0x2   :  { %v1699_v1 = vld [vmem:[%s1911_s0] sm:$0xff]  ;;  %1485 = vmatprep.subr.mxu1 %v22_v0  ;;  %vm1718_vm3 = vmpackc.low %vm113_vm2, %vm113_vm2  ;;  %v105_v14 = vld [vmem:[%s1910_s2 + $0x50] sm:$0x1]  ;;  %v1672_v27 = vmov -1e+30  }
   0x3   :  { %1487 = vmatprep.mubr.msk.f32.mxu1 %vm23_vm0, %v1699_v1  ;;  %1486 = vmatpush3.msra.mxu1 %v22_v0  ;;  %v200_v16 = vshrl.u32 %v199_v15, 7  ;;  %v16_v19 = vld [vmem:[%s1912_s1] sm:$0xff]  ;;  %v17_v23 = vld [vmem:[%s1912_s1 + $0x8] sm:$0xff]  ;;  %v1405_v57 = vld [vmem:[%s1910_s2 + $0x53] ss:$0 sm:$0xff] }
   0x4   :  { %1488 = vmatmul.mubr.msk.f32.vlgmr.msra.gmra.mrb[0].mxu1 %vm23_vm0, %v1704_v2  ;;  %1579 = vmatprep.subr.bf16.mxu1 %v1669_v3  ;;  %vm18_vm4 = vcmp.gt.f32.partialorder %v16_v19, 0.0  ;;  %vm19_vm5 = vcmp.gt.f32.partialorder %v17_v23, 0.0  ;;  %v321_v48 = vld [vmem:[%s1910_s2 + $0x8] sm:$0xff] }
   0x5   :  { %1494 = vmatprep.mubr.msk.f32.mxu1 %vm1670_vm1, %v1671_v4  ;;  %v1733_v18 = vsub.s32 0, %v200_v16  ;;  %v1742_v28 = vsel %vm18_vm4, 0.0, %v1672_v27  ;;  %v1744_v32 = vsel %vm19_vm5, 0.0, %v1672_v27 }
  0xd7   :  { %v1489_v6 = vpop.f32.mrb[0].mxu1 }
  0xd8   :  { %v96_v7 = vpop.f32.mrb[1].mxu1  ;;  %v112_v11 = vmul.f32 %v1489_v6, %v1396_v5 }
  0xd9   :  { %v1580_v9 = vpack.c.bf16 %v1489_v6, %v96_v7  ;;  %v111_v10 = vmul.f32 %v1396_v5, %v96_v7 }
  0xda   :  { %v117_v13 = vsel %vm113_vm2, %v112_v11, 0.0 }
  0xdb   :  { %1582 = vmatpush3.bf16.xpose.msk.msra.mxu1 %vm1718_vm3, %v1580_v9  ;;  %1584 = vmatprep.subr.bf16.mxu0 %v1580_v9  ;;  %v114_v12 = vsel %vm113_vm2, %v111_v10, 0.0 }
  0xdc   :  { %1586 = vmatpush3.bf16.msra.mxu0 %v1580_v9  ;;  %115 = vadd.xlane.f32.xlu0 %v114_v12 }
  0xdd   :  { %1587 = vmatprep.subr.bf16.mxu1 %v1669_v3  ;;  %1504 = vmatprep.subr.mxu0 %v321_v48 }
  0xe0   :  { %118 = vadd.xlane.f32.xlu0 %v117_v13 }
  0xe2   :  { %1495 = vmatmul.mubr.msk.f32.vlgmr.msra.gmra.mrb[2].mxu1 %vm113_vm2, %v105_v14 }
  0xe3   :  { %1513 = vmatprep.mubr.msk.f32.mxu1 %vm1670_vm1, %v1671_v4 }
 0x169   :  { %v116_v17 = vpop.xlane.xlu0 %115 }
 0x16d   :  { %v119_v24 = vpop.xlane.xlu0 %118 }
 0x1b5   :  { %v195_v20 = vpop.f32.mrb[2].mxu1 }
 0x1b6   :  { %v202_v21 = vrot.slane %v195_v20, %v1733_v18  ;;  %v1496_v22 = vpop.f32.mrb[3].mxu1 }
 0x1b8   :  { %v203_v25 = vadd.f32 %v202_v21, %v116_v17  ;;  %v204_v26 = vadd.f32 %v202_v21, %v119_v24 }
 0x1ba   :  { %v207_v29 = vmul.f32 0.2, %v203_v25  ;;  %v208_v30 = vmul.f32 0.2, %v204_v26  ;;  %vm205_vm6 = vcmp.gt.f32.partialorder %v203_v25, 0.0  ;;  %vm206_vm7 = vcmp.gt.f32.partialorder %v204_v26, 0.0 }
 0x1bc   :  { %v209_v31 = vsel %vm205_vm6, %v203_v25, %v207_v29  ;;  %v210_v33 = vsel %vm206_vm7, %v204_v26, %v208_v30 }
 0x1bd   :  { %v211_v34 = vadd.f32 %v209_v31, %v1742_v28  ;;  %v212_v36 = vadd.f32 %v210_v33, %v1744_v32 }
 0x1bf   :  { %v213_v35 = vsel %vm113_vm2, %v211_v34, -inf  ;;  %v216_v37 = vsel %vm113_vm2, %v212_v36, -inf }
 0x1c0   :  { %214 = vmax.xlane.f32.xlu1 %v213_v35 }
 0x1c4   :  { %217 = vmax.xlane.f32.xlu1 %v216_v37 }
 0x24d   :  { %v215_v38 = vpop.xlane.xlu1 %214 }
 0x24e   :  { %v219_v39 = vsub.f32 %v211_v34, %v215_v38 }
 0x250   :  { %v221_v40 = vmul.f32 1.442695, %v219_v39  ;;  %v614_v39 = vld [vmem:[%s1910_s2 + $0x20] sm:$0xff] }
 0x251   :  { %v218_v41 = vpop.xlane.xlu1 %217 }
 0x252   :  { %1637 = vpow2.f32 %v221_v40  ;;  %v220_v42 = vsub.f32 %v212_v36, %v218_v41  ;;  %v615_v40 = vld [vmem:[%s1910_s2 + $0x28] sm:$0xff] }
 0x253   :  { %v1595_v41 = vpack.c.bf16 %v615_v40, %v614_v39 }
 0x254   :  { %v223_v43 = vmul.f32 1.442695, %v220_v42  ;;  %v612_v42 = vld [vmem:[%s1910_s2 + $0x10] sm:$0xff] }
 0x256   :  { %1639 = vpow2.f32 %v223_v43  ;;  %v613_v43 = vld [vmem:[%s1910_s2 + $0x18] sm:$0xff] }
 0x25c   :  { %v1638_v44 = vpop.eup %1637 }
 0x25d   :  { %v225_v45 = vsel %vm113_vm2, %v1638_v44, 0.0 }
 0x25e   :  { %226 = vadd.xlane.f32.xlu0 %v225_v45  ;;  %v1409_v45 = vld [vmem:[%s1910_s2 + $0x55] ss:$0 sm:$0xff] }
 0x260   :  { %v1640_v46 = vpop.eup %1639 }
 0x261   :  { %v228_v47 = vsel %vm113_vm2, %v1640_v46, 0.0 }
 0x262   :  { %229 = vadd.xlane.f32.xlu1 %v228_v47  ;;  %v922_v47 = vld [vmem:[%s1910_s2 + $0x40] sm:$0xff] }
 0x2eb   :  { %v227_v49 = vpop.xlane.xlu0 %226 }
 0x2ec   :  { %1641 = vrcp.f32 %v227_v49  ;;  %v1400_v49 = vld [vmem:[%s1910_s2 + $0x54] ss:$0 sm:$0xff] }
 0x2ef   :  { %v230_v50 = vpop.xlane.xlu1 %229 }
 0x2f0   :  { %1643 = vrcp.f32 %v230_v50 }
 0x2f6   :  { %v1642_v51 = vpop.eup %1641 }
 0x2f7   :  { %v233_v52 = vmul.f32 %v1642_v51, %v1638_v44  ;;  %v1599_v44 = vpack.c.bf16 %v613_v43, %v612_v42 }
 0x2f9   :  { %1501 = vmatprep.mubr.msk.f32.mxu0 %vm113_vm2, %v233_v52 }
 0x2fa   :  { %v1644_v53 = vpop.eup %1643 }
 0x2fb   :  { %v234_v54 = vmul.f32 %v1644_v53, %v1640_v46 }
 0x2fd   :  { %1502 = vmatmul.mubr.msk.f32.vlgmr.msra.gmra.mrb[0].mxu0 %vm113_vm2, %v234_v54 }
 0x2fe   :  { %1505 = vmatpush3.msra.mxu0 %v321_v48  ;;  %1506 = vmatprep.mubr.msk.f32.mxu0 %vm23_vm0, %v1699_v1  ;;  %v397_v1 = vld [vmem:[%s1910_s2 + $0x51] sm:$0x1]  ;;  %v923_v48 = vld [vmem:[%s1910_s2 + $0x48] sm:$0xff] }
 0x2ff   :  { %v1607_v53 = vpack.c.bf16 %v923_v48, %v922_v47 }
 0x301   :  { %1507 = vmatmul.mubr.msk.f32.vlgmr.msra.gmra.mrb[2].mxu0 %vm23_vm0, %v1704_v2 }
 0x3d0   :  { %v1761_v55 = vpop.f32.mrb[0].mxu0 }
 0x3d1   :  { %v1763_v56 = vpop.f32.mrb[1].mxu0 }
 0x3d2   :  { %v313_v54 = vadd.f32 %v1400_v49, %v1763_v56 }
 0x3d4   :  { %v1508_v58 = vpop.f32.mrb[2].mxu0 }
 0x3d5   :  { %v404_v59 = vmul.f32 %v1508_v58, %v1405_v57  ;;  %v388_v60 = vpop.f32.mrb[3].mxu0 }
 0x3d6   :  { %v403_v61 = vmul.f32 %v1405_v57, %v388_v60  ;;  %v1588_v62 = vpack.c.bf16 %v1508_v58, %v388_v60  ;;  %v920_v57 = vld [vmem:[%s1910_s2 + $0x30] sm:$0xff]  ;;  %v921_v58 = vld [vmem:[%s1910_s2 + $0x38] sm:$0xff] }
 0x3d7   :  { %v408_v63 = vsel %vm113_vm2, %v404_v59, 0.0  ;;  %v318_v59 = vadd.f32 %v1761_v55, %v1400_v49  ;;  %v1611_v60 = vpack.c.bf16 %v921_v58, %v920_v57  ;;  %v1429_v57 = vld [vmem:[%s1910_s2 + $0x5b] ss:$0 sm:$0xff] }
 0x3d8   :  { %409 = vadd.xlane.f32.xlu1 %v408_v63  ;;  %1590 = vmatpush3.bf16.xpose.msk.msra.mxu1 %vm1718_vm3, %v1588_v62  ;;  %v405_v0 = vsel %vm113_vm2, %v403_v61, 0.0  ;;  %v1425_v63 = vld [vmem:[%s1910_s2 + $0x59] ss:$0 sm:$0xff] }
 0x3d9   :  { %1592 = vmatprep.subr.bf16.mxu0 %v1588_v62  ;;  %406 = vadd.xlane.f32.xlu0 %v405_v0 }
 0x3da   :  { %1594 = vmatpush3.bf16.msra.mxu0 %v1588_v62  ;;  %1603 = vmatprep.subr.bf16.mxu1 %v1669_v3  ;;  %v778_v62 = vld [vmem:[%s1910_s2 + $0x56] sm:$0x1] }
 0x3db   :  { %1596 = vmatprep.subr.bf16.mxu0 %v1595_v41 }
 0x3df   :  { %1514 = vmatmul.mubr.msk.f32.vlgmr.msra.gmra.mrb[4].mxu1 %vm113_vm2, %v397_v1  ;;  %v1416_v1 = vld [vmem:[%s1910_s2 + $0x58] ss:$0 sm:$0xff] }
 0x3e0   :  { %1541 = vmatprep.mubr.msk.f32.mxu1 %vm1670_vm1, %v1671_v4 }
 0x465   :  { %v410_v7 = vpop.xlane.xlu1 %409 }
 0x466   :  { %v407_v9 = vpop.xlane.xlu0 %406 }
 0x4b2   :  { %v486_v2 = vpop.f32.mrb[4].mxu1 }
 0x4b3   :  { %v493_v5 = vrot.slane %v486_v2, %v1733_v18  ;;  %v1515_v6 = vpop.f32.mrb[5].mxu1 }
 0x4b5   :  { %v494_v10 = vadd.f32 %v493_v5, %v407_v9  ;;  %v495_v11 = vadd.f32 %v493_v5, %v410_v7 }
 0x4b7   :  { %v498_v12 = vmul.f32 0.2, %v494_v10  ;;  %v499_v13 = vmul.f32 0.2, %v495_v11  ;;  %vm497_vm8 = vcmp.gt.f32.partialorder %v495_v11, 0.0  ;;  %vm496_vm9 = vcmp.gt.f32.partialorder %v494_v10, 0.0 }
 0x4b9   :  { %v501_v14 = vsel %vm497_vm8, %v495_v11, %v499_v13  ;;  %v500_v15 = vsel %vm496_vm9, %v494_v10, %v498_v12  ;;  %v1074_v13 = vld [vmem:[%s1910_s2 + $0x57] sm:$0x1] }
 0x4ba   :  { %v503_v16 = vadd.f32 %v501_v14, %v1744_v32  ;;  %v502_v17 = vadd.f32 %v500_v15, %v1742_v28 }
 0x4bc   :  { %v507_v19 = vsel %vm113_vm2, %v503_v16, -inf  ;;  %v504_v20 = vsel %vm113_vm2, %v502_v17, -inf }
 0x4bd   :  { %508 = vmax.xlane.f32.xlu1 %v507_v19  ;;  %505 = vmax.xlane.f32.xlu0 %v504_v20 }
 0x54a   :  { %v509_v21 = vpop.xlane.xlu1 %508  ;;  %v506_v22 = vpop.xlane.xlu0 %505 }
 0x54b   :  { %v511_v23 = vsub.f32 %v503_v16, %v509_v21  ;;  %v510_v24 = vsub.f32 %v502_v17, %v506_v22 }
 0x54d   :  { %v514_v25 = vmul.f32 1.442695, %v511_v23  ;;  %v512_v26 = vmul.f32 1.442695, %v510_v24 }
 0x54f   :  { %1645 = vpow2.f32 %v514_v25 }
 0x550   :  { %1647 = vpow2.f32 %v512_v26 }
 0x559   :  { %v1646_v27 = vpop.eup %1645 }
 0x55a   :  { %v1648_v29 = vpop.eup %1647  ;;  %v519_v30 = vsel %vm113_vm2, %v1646_v27, 0.0 }
 0x55b   :  { %520 = vadd.xlane.f32.xlu1 %v519_v30  ;;  %v516_v31 = vsel %vm113_vm2, %v1648_v29, 0.0 }
 0x55c   :  { %517 = vadd.xlane.f32.xlu0 %v516_v31 }
 0x5e8   :  { %v521_v33 = vpop.xlane.xlu1 %520 }
 0x5e9   :  { %1649 = vrcp.f32 %v521_v33  ;;  %v518_v34 = vpop.xlane.xlu0 %517 }
 0x5ea   :  { %1651 = vrcp.f32 %v518_v34 }
 0x5f3   :  { %v1650_v35 = vpop.eup %1649 }
 0x5f4   :  { %v1652_v36 = vpop.eup %1651  ;;  %v525_v37 = vmul.f32 %v1650_v35, %v1646_v27 }
 0x5f5   :  { %v524_v38 = vmul.f32 %v1652_v36, %v1648_v29 }
 0x5f7   :  { %1520 = vmatprep.mubr.msk.f32.mxu0 %vm113_vm2, %v524_v38 }
 0x5f8   :  { %1521 = vmatmul.mubr.msk.f32.vlgmr.msra.gmra.mrb[4].mxu0 %vm113_vm2, %v525_v37 }
 0x5f9   :  { %1598 = vmatpush3.bf16.msra.mxu0 %v1595_v41 }
 0x5fa   :  { %1600 = vmatprep.subr.bf16.mxu0 %v1599_v44 }
 0x6cb   :  { %v1522_v46 = vpop.f32.mrb[4].mxu0 }
 0x6cc   :  { %v603_v50 = vpop.f32.mrb[5].mxu0  ;;  %v609_v52 = vadd.f32 %v1522_v46, %v1409_v45 }
 0x6cd   :  { %v604_v51 = vadd.f32 %v1409_v45, %v603_v50 }
 0x6cf   :  { %1527 = vmatprep.mubr.msk.f32.mxu0 %vm113_vm2, %v604_v51 }
 0x6d0   :  { %1528 = vmatmul.mubr.msk.f32.vlgmr.msra.gmra.mrb[6].mxu0 %vm113_vm2, %v609_v52 }
 0x6d1   :  { %1602 = vmatpush3.bf16.msra.mxu0 %v1599_v44  ;;  %1534 = vmatprep.mubr.msk.f32.mxu0 %vm113_vm2, %v313_v54 }
 0x6d2   :  { %1608 = vmatprep.subr.bf16.mxu0 %v1607_v53 }
 0x6d8   :  { %1535 = vmatmul.mubr.msk.f32.vlgmr.msra.gmra.mrb[6].mxu0 %vm113_vm2, %v318_v59 }
 0x6d9   :  { %1610 = vmatpush3.bf16.msra.mxu0 %v1607_v53  ;;  %1548 = vmatprep.mubr.msk.f32.mxu0 %vm113_vm2, %v604_v51 }
 0x6da   :  { %1612 = vmatprep.subr.bf16.mxu0 %v1611_v60 }
 0x6dc   :  { %1549 = vmatmul.mubr.msk.f32.vlgmr.msra.gmra.mrb[8].mxu0 %vm113_vm2, %v609_v52 }
 0x6dd   :  { %1614 = vmatpush3.bf16.msra.mxu0 %v1611_v60  ;;  %1555 = vmatprep.mubr.msk.f32.mxu0 %vm113_vm2, %v313_v54 }
 0x6e4   :  { %1556 = vmatmul.mubr.msk.f32.vlgmr.msra.gmra.mrb[8].mxu0 %vm113_vm2, %v318_v59 }
 0x7ab   :  { %v1828_v56 = vpop.f32.mrb[6].mxu0 }
 0x7ac   :  { %v1830_v61 = vpop.f32.mrb[7].mxu0  ;;  %v785_v9 = vmul.f32 %v1828_v56, %v1416_v1 }
 0x7ad   :  { %v1604_v55 = vpack.c.bf16 %v1828_v56, %v1830_v61 }
 0x7ae   :  { %v789_v11 = vsel %vm113_vm2, %v785_v9, 0.0 }
 0x7af   :  { %1606 = vmatpush3.bf16.xpose.msk.msra.mxu1 %vm1718_vm3, %v1604_v55 }
 0x7b0   :  { %1615 = vmatprep.subr.bf16.mxu1 %v1669_v3 }
 0x7b6   :  { %1542 = vmatmul.mubr.msk.f32.vlgmr.msra.gmra.mrb[6].mxu1 %vm113_vm2, %v778_v62 }
 0x7b7   :  { %v1844_v0 = vpop.f32.mrb[8].mxu0  ;;  %1562 = vmatprep.mubr.msk.f32.mxu1 %vm1670_vm1, %v1671_v4  ;;  %v784_v4 = vmul.f32 %v1416_v1, %v1830_v61 }
 0x7b8   :  { %v1851_v3 = vpop.f32.mrb[9].mxu0  ;;  %v1081_v2 = vmul.f32 %v1844_v0, %v1425_v63 }
 0x7b9   :  { %v1616_v5 = vpack.c.bf16 %v1844_v0, %v1851_v3  ;;  %v1080_v6 = vmul.f32 %v1425_v63, %v1851_v3  ;;  %v786_v12 = vsel %vm113_vm2, %v784_v4, 0.0  ;;  %v1208_v55 = vmul.f32 %v1429_v57, %v1851_v3 }
 0x7ba   :  { %v1085_v7 = vsel %vm113_vm2, %v1081_v2, 0.0 }
 0x7bb   :  { %1086 = vadd.xlane.f32.xlu1 %v1085_v7  ;;  %1618 = vmatpush3.bf16.xpose.msk.msra.mxu1 %vm1718_vm3, %v1616_v5  ;;  %v1082_v10 = vsel %vm113_vm2, %v1080_v6, 0.0  ;;  %v1210_v1 = vsel %vm113_vm2, %v1208_v55, 0.0  ;;  %v1209_v6 = vmul.f32 %v1844_v0, %v1429_v57  ;;  %v1420_v7 = vld [vmem:[%s1910_s2 + $0x5a] ss:$0 sm:$0xff] }
 0x7bc   :  { %1083 = vadd.xlane.f32.xlu0 %v1082_v10  ;;  %v913_v9 = vmul.f32 %v1828_v56, %v1420_v7  ;;  %v912_v4 = vmul.f32 %v1420_v7, %v1830_v61 }
 0x7bd   :  { %v1213_v10 = vsel %vm113_vm2, %v1209_v6, 0.0 }
 0x7be   :  { %v914_v0 = vsel %vm113_vm2, %v912_v4, 0.0 }
 0x7bf   :  { %790 = vadd.xlane.f32.xlu1 %v789_v11  ;;  %v917_v11 = vsel %vm113_vm2, %v913_v9, 0.0 }
 0x7c0   :  { %787 = vadd.xlane.f32.xlu0 %v786_v12 }
 0x7c2   :  { %1563 = vmatmul.mubr.msk.f32.vlgmr.msra.gmra.mrb[8].mxu1 %vm113_vm2, %v1074_v13 }
 0x848   :  { %v1087_v15 = vpop.xlane.xlu1 %1086 }
 0x849   :  { %v1084_v16 = vpop.xlane.xlu0 %1083 }
 0x84c   :  { %v791_v19 = vpop.xlane.xlu1 %790 }
 0x84d   :  { %v788_v20 = vpop.xlane.xlu0 %787 }
 0x889   :  { %v867_v14 = vpop.f32.mrb[6].mxu1 }
 0x88a   :  { %v1543_v8 = vpop.f32.mrb[7].mxu1  ;;  %v874_v17 = vrot.slane %v867_v14, %v1733_v18 }
 0x88c   :  { %v875_v21 = vadd.f32 %v874_v17, %v788_v20  ;;  %v876_v22 = vadd.f32 %v874_v17, %v791_v19 }
 0x88e   :  { %v879_v26 = vmul.f32 0.2, %v875_v21  ;;  %v880_v27 = vmul.f32 0.2, %v876_v22  ;;  %vm878_vm10 = vcmp.gt.f32.partialorder %v876_v22, 0.0  ;;  %vm877_vm11 = vcmp.gt.f32.partialorder %v875_v21, 0.0 }
 0x890   :  { %v882_v36 = vsel %vm878_vm10, %v876_v22, %v880_v27  ;;  %v881_v37 = vsel %vm877_vm11, %v875_v21, %v879_v26 }
 0x891   :  { %v884_v41 = vadd.f32 %v882_v36, %v1744_v32  ;;  %v883_v42 = vadd.f32 %v881_v37, %v1742_v28 }
 0x893   :  { %v888_v43 = vsel %vm113_vm2, %v884_v41, -inf  ;;  %v885_v44 = vsel %vm113_vm2, %v883_v42, -inf }
 0x895   :  { %v1163_v23 = vpop.f32.mrb[8].mxu1 }
 0x896   :  { %v1170_v24 = vrot.slane %v1163_v23, %v1733_v18  ;;  %v1564_v25 = vpop.f32.mrb[9].mxu1 }
 0x898   :  { %v1171_v29 = vadd.f32 %v1170_v24, %v1084_v16  ;;  %v1172_v30 = vadd.f32 %v1170_v24, %v1087_v15 }
 0x89a   :  { %v1175_v31 = vmul.f32 0.2, %v1171_v29  ;;  %v1176_v33 = vmul.f32 0.2, %v1172_v30  ;;  %vm1174_vm12 = vcmp.gt.f32.partialorder %v1172_v30, 0.0  ;;  %vm1173_vm13 = vcmp.gt.f32.partialorder %v1171_v29, 0.0 }
 0x89c   :  { %v1178_v34 = vsel %vm1174_vm12, %v1172_v30, %v1176_v33  ;;  %v1177_v35 = vsel %vm1173_vm13, %v1171_v29, %v1175_v31  ;;  %v1434_v29 = vld [vmem:[%s1910_s2 + $0x5c] ss:$0 sm:$0xff] }
 0x89d   :  { %v1180_v38 = vadd.f32 %v1178_v34, %v1744_v32  ;;  %v1179_v39 = vadd.f32 %v1177_v35, %v1742_v28 }
 0x89f   :  { %v1184_v18 = vsel %vm113_vm2, %v1180_v38, -inf  ;;  %v1181_v40 = vsel %vm113_vm2, %v1179_v39, -inf }
 0x8a0   :  { %1185 = vmax.xlane.f32.xlu1 %v1184_v18  ;;  %1182 = vmax.xlane.f32.xlu0 %v1181_v40 }
 0x8a4   :  { %889 = vmax.xlane.f32.xlu1 %v888_v43  ;;  %886 = vmax.xlane.f32.xlu0 %v885_v44 }
 0x92d   :  { %v1186_v45 = vpop.xlane.xlu1 %1185  ;;  %v1183_v46 = vpop.xlane.xlu0 %1182 }
 0x92e   :  { %v1188_v47 = vsub.f32 %v1180_v38, %v1186_v45  ;;  %v1187_v48 = vsub.f32 %v1179_v39, %v1183_v46 }
 0x930   :  { %v1191_v49 = vmul.f32 1.442695, %v1188_v47  ;;  %v1189_v50 = vmul.f32 1.442695, %v1187_v48 }
 0x931   :  { %v890_v51 = vpop.xlane.xlu1 %889  ;;  %v887_v52 = vpop.xlane.xlu0 %886 }
 0x932   :  { %1653 = vpow2.f32 %v1191_v49  ;;  %v892_v32 = vsub.f32 %v884_v41, %v890_v51  ;;  %v891_v53 = vsub.f32 %v883_v42, %v887_v52 }
 0x933   :  { %1655 = vpow2.f32 %v1189_v50 }
 0x934   :  { %v895_v28 = vmul.f32 1.442695, %v892_v32  ;;  %v893_v54 = vmul.f32 1.442695, %v891_v53 }
 0x936   :  { %1657 = vpow2.f32 %v893_v54 }
 0x937   :  { %1659 = vpow2.f32 %v895_v28 }
 0x93c   :  { %v1654_v58 = vpop.eup %1653 }
 0x93d   :  { %v1656_v59 = vpop.eup %1655  ;;  %v1196_v60 = vsel %vm113_vm2, %v1654_v58, 0.0 }
 0x93e   :  { %1197 = vadd.xlane.f32.xlu1 %v1196_v60  ;;  %v1193_v62 = vsel %vm113_vm2, %v1656_v59, 0.0 }
 0x93f   :  { %1194 = vadd.xlane.f32.xlu0 %v1193_v62 }
 0x940   :  { %v1658_v63 = vpop.eup %1657 }
 0x941   :  { %v1660_v2 = vpop.eup %1659  ;;  %v897_v5 = vsel %vm113_vm2, %v1658_v63, 0.0 }
 0x942   :  { %1211 = vadd.xlane.f32.xlu1 %v1210_v1  ;;  %v900_v3 = vsel %vm113_vm2, %v1660_v2, 0.0 }
 0x943   :  { %898 = vadd.xlane.f32.xlu0 %v897_v5 }
 0x946   :  { %901 = vadd.xlane.f32.xlu1 %v900_v3 }
 0x947   :  { %1214 = vadd.xlane.f32.xlu0 %v1213_v10 }
 0x94a   :  { %918 = vadd.xlane.f32.xlu1 %v917_v11 }
 0x94b   :  { %915 = vadd.xlane.f32.xlu0 %v914_v0 }
 0x9cb   :  { %v1198_v12 = vpop.xlane.xlu1 %1197 }
 0x9cc   :  { %1661 = vrcp.f32 %v1198_v12  ;;  %v1195_v13 = vpop.xlane.xlu0 %1194 }
 0x9cd   :  { %1663 = vrcp.f32 %v1195_v13 }
 0x9cf   :  { %v1212_v14 = vpop.xlane.xlu1 %1211 }
 0x9d0   :  { %v899_v8 = vpop.xlane.xlu0 %898 }
 0x9d1   :  { %1665 = vrcp.f32 %v899_v8 }
 0x9d3   :  { %v902_v56 = vpop.xlane.xlu1 %901 }
 0x9d4   :  { %1667 = vrcp.f32 %v902_v56  ;;  %v1215_v15 = vpop.xlane.xlu0 %1214 }
 0x9d5   :  { %v1619_v16 = vpack.c.bf16 %v1215_v15, %v1212_v14 }
 0x9d6   :  { %v1662_v17 = vpop.eup %1661 }
 0x9d7   :  { %v1664_v61 = vpop.eup %1663  ;;  %v1202_v19 = vmul.f32 %v1662_v17, %v1654_v58  ;;  %1620 = vmatprep.subr.bf16.mxu0 %v1619_v16  ;;  %v919_v20 = vpop.xlane.xlu1 %918 }
 0x9d8   :  { %1622 = vmatpush3.bf16.msra.mxu0 %v1619_v16  ;;  %v916_v21 = vpop.xlane.xlu0 %915  ;;  %v1201_v22 = vmul.f32 %v1664_v61, %v1656_v59 }
 0x9d9   :  { %v1623_v23 = vpack.c.bf16 %v919_v20, %v916_v21 }
 0x9da   :  { %1569 = vmatprep.mubr.msk.f32.mxu0 %vm113_vm2, %v1201_v22 }
 0x9db   :  { %v1666_v24 = vpop.eup %1665  ;;  %1570 = vmatmul.mubr.msk.f32.vlgmr.msra.gmra.mrb[10].mxu0 %vm113_vm2, %v1202_v19  ;;  %1624 = vmatprep.subr.bf16.mxu0 %v1623_v23 }
 0x9dc   :  { %1626 = vmatpush3.bf16.msra.mxu0 %v1623_v23  ;;  %v905_v25 = vmul.f32 %v1666_v24, %v1658_v63 }
 0x9de   :  { %v1668_v26 = vpop.eup %1667  ;;  %1576 = vmatprep.mubr.msk.f32.mxu0 %vm113_vm2, %v905_v25 }
 0x9df   :  { %v906_v27 = vmul.f32 %v1668_v26, %v1660_v2 }
 0x9e3   :  { %1577 = vmatmul.mubr.msk.f32.vlgmr.msra.gmra.mrb[10].mxu0 %vm113_vm2, %v906_v27 }
 0xab6   :  { %v1578_v30 = vpop.f32.mrb[10].mxu0 }
 0xab7   :  { %v1384_v31 = vadd.f32 %v1578_v30, %v1434_v29  ;;  %v1369_v33 = vpop.f32.mrb[11].mxu0 }
 0xab8   :  { %v1383_v34 = vadd.f32 %v1434_v29, %v1369_v33 }
 0xab9   :  { %v1386_v35 = vmax.f32 %v1384_v31, 0.0 }
 0xaba   :  { %v1385_v36 = vmax.f32 %v1383_v34, 0.0 }
 0xabb   :  { %1389 = vst.msk [vmem:[%s1913_s3 + $0x8] sm:$0xff] %vm1387_vm14, %v1386_v35 }
 0xabc   :  { %1388 = vst.msk [vmem:[%s1913_s3] sm:$0xff] %vm1387_vm14, %v1385_v36 }

</bundles_post_ra>
